<compile_context>
chip_gen: v7x
topology: tpu7x:2x2x1
jax: 0.10.0
libtpu: 0.0.40
codegen_flags: <defaults>
</compile_context>

<pallas_src>
import functools

import jax
import jax.numpy as jnp
from jax.experimental import pallas as pl
from jax.experimental.pallas import tpu as pltpu

_LN2 = 0.6931471805599453


def _round_up(x, m):
    return ((x + m - 1) // m) * m


def _stable_log_cosh(x):
    # log(cosh(x)) = |x| + log1p(exp(-2|x|)) - log(2); overflow-free in f32.
    # NOTE: intentionally finite where torch.log(torch.cosh(x)) returns inf
    # (|x| >~ 89 in f32); the mathematically correct value is returned.
    a = jnp.abs(x)
    return a + jnp.log1p(jnp.exp(-2.0 * a)) - _LN2


def _tile_body(pred_ref, tgt_ref, w_ref, out_ref, acc_ref, *, eps, inv_total,
               rows_total, tile_rows, tiles_per_core, may_mask):
    c = pl.program_id(0)          # core-parallel axis (both TCs on v7x)
    i = pl.program_id(1)          # sequential reduction axis

    @pl.when(i == 0)
    def _():
        acc_ref[...] = jnp.zeros_like(acc_ref)

    x = pred_ref[...].astype(jnp.float32) - tgt_ref[...].astype(jnp.float32) + eps
    loss = _stable_log_cosh(x)
    if w_ref is not None:
        # weight.unsqueeze(0): (1, lane) broadcast across the batch-tile rows.
        loss = loss * w_ref[...].astype(jnp.float32)

    tr, tc = loss.shape

    def fold(v):
        # Pure-VPU fold of row groups of 8 onto the vreg-shaped accumulator.
        acc_ref[...] += v.reshape(tr // 8, 8, tc).sum(axis=0)

    if may_mask:
        start = (c * tiles_per_core + i) * tile_rows
        needs_mask = start + tile_rows > rows_total

        @pl.when(needs_mask)                      # padded tail / phantom tiles
        def _():
            rows_left = rows_total - start
            row_ids = jax.lax.broadcasted_iota(jnp.int32, loss.shape, 0)
            # Must stay a select: OOB rows may contain Inf/NaN garbage.
            fold(jnp.where(row_ids < rows_left, loss, 0.0))

        @pl.when(jnp.logical_not(needs_mask))     # steady state: zero mask ops
        def _():
            fold(loss)
    else:
        fold(loss)

    @pl.when(i == pl.num_programs(1) - 1)
    def _():
        # One cross-lane/sublane reduction per core; mean folded in here.
        part = jnp.sum(acc_ref[...]) * inv_total
        lane_ids = jax.lax.broadcasted_iota(jnp.int32, out_ref.shape, 1)
        out_ref[...] = jnp.where(lane_ids == 0, part, 0.0)


def _kernel_weighted(pred_ref, tgt_ref, w_ref, out_ref, acc_ref, **kw):
    _tile_body(pred_ref, tgt_ref, w_ref, out_ref, acc_ref, **kw)


def _kernel_unweighted(pred_ref, tgt_ref, out_ref, acc_ref, **kw):
    _tile_body(pred_ref, tgt_ref, None, out_ref, acc_ref, **kw)


def _choose_lane_width(total, n):
    """Lane-dense width (multiple of 128) dividing total, preferring >=8 rows."""
    cands = [c for c in (4096, 2048, 1024, 512, 256, 128) if total % c == 0]
    if not cands:
        return n
    good = [c for c in cands if (total // c) >= 8]
    return (good or cands)[0]


def _choose_group(b, n):
    """Batch-group size g: b % g == 0 and (g*n) % 128 == 0, lane-dense & tall."""
    max_g = min(b, max(1, 8192 // max(n, 1)))
    valid = [g for g in range(1, max_g + 1)
             if b % g == 0 and (g * n) % 128 == 0]
    if not valid:
        return None

    def score(g):
        lane = g * n
        return ((b // g) >= 8, 512 <= lane <= 4096, lane)

    return max(valid, key=score)


def _choose_row_tile(rows, lane, block_bytes):
    """Row tile (multiple of 8) sized toward ~block_bytes f32 per input block."""
    fit = max(8, block_bytes // (4 * lane))
    if fit >= rows:
        return _round_up(rows, 8)
    return max(16, (fit // 16) * 16)


def log_cosh_loss(pred, target, weight=None, eps=1e-12, block_bytes=4 << 20):
    """Pallas implementation of LogCoshLoss.forward. Returns a float32 scalar."""
    assert pred.shape == target.shape and pred.ndim == 2
    B, N = pred.shape
    total = B * N

    if weight is None:
        # Pure elementwise + reduce: flatten to a lane-dense slab.
        lane = _choose_lane_width(total, N)
        rows = total // lane
        operands = (pred.reshape(rows, lane), target.reshape(rows, lane))
        has_weight = False
    else:
        assert weight.shape == (N,)
        g = _choose_group(B, N)
        if g is None:
            g = 1  # fallback: lane = N (partially-filled vregs, still correct)
        lane = g * N
        rows = B // g
        operands = (pred.reshape(rows, lane), target.reshape(rows, lane),
                    jnp.tile(weight, g).reshape(1, lane))
        has_weight = True

    tile_r = _choose_row_tile(rows, lane, block_bytes)
    n_tiles = -(-rows // tile_r)
    n_cores = 2 if n_tiles >= 2 else 1          # both TCs on v7x; no-op on 1-TC chips
    tiles_pc = -(-n_tiles // n_cores)
    may_mask = (n_cores * tiles_pc * tile_r) > rows

    if n_cores * tiles_pc == n_tiles:
        def data_idx(c, i):
            return (c * tiles_pc + i, 0)
    else:
        # Phantom tiles of the last core re-fetch the last real block (clamped
        # index) and are fully masked in the kernel.
        def data_idx(c, i):
            return (jnp.minimum(c * tiles_pc + i, n_tiles - 1), 0)

    data_spec = pl.BlockSpec((tile_r, lane), data_idx)
    in_specs = [data_spec, data_spec]
    if has_weight:
        in_specs.append(pl.BlockSpec((1, lane), lambda c, i: (0, 0)))  # resident

    kw = dict(eps=eps, inv_total=1.0 / total, rows_total=rows,
              tile_rows=tile_r, tiles_per_core=tiles_pc, may_mask=may_mask)
    kernel = functools.partial(
        _kernel_weighted if has_weight else _kernel_unweighted, **kw)

    partials = pl.pallas_call(
        kernel,
        out_shape=jax.ShapeDtypeStruct((1, n_cores * 128), jnp.float32),
        grid_spec=pltpu.PrefetchScalarGridSpec(
            num_scalar_prefetch=0,
            grid=(n_cores, tiles_pc),
            in_specs=in_specs,
            out_specs=pl.BlockSpec((1, 128), lambda c, i: (0, c)),
            scratch_shapes=[pltpu.VMEM((8, lane), jnp.float32)],
        ),
        compiler_params=pltpu.CompilerParams(
            dimension_semantics=("parallel", "arbitrary"),
            vmem_limit_bytes=32 * 1024 * 1024,   # safe on v5e/v6e/v7x
        ),
    )(*operands)

    # Per-core partials are already scaled by 1/total; non-partial lanes are 0.
    return jnp.sum(partials)


def _reference(pred, target, weight=None, eps=1e-12):
    diff = pred - target
    loss = jnp.log(jnp.cosh(diff + eps))
    if weight is not None:
        loss = loss * weight[None, :]
    return jnp.mean(loss)


if __name__ == "__main__":
    key = jax.random.PRNGKey(0)
    k1, k2, k3, k4, k5, k6, k7 = jax.random.split(key, 7)

    # 1) Basic weighted case (batch=16, features=128).
    B, N = 16, 128
    pred = jax.random.normal(k1, (B, N), dtype=jnp.float32)
    target = jax.random.normal(k2, (B, N), dtype=jnp.float32)
    weight = jax.random.uniform(k3, (N,), dtype=jnp.float32)
    out_w = log_cosh_loss(pred, target, weight)
    jax.block_until_ready(out_w)
    ref_w = _reference(pred, target, weight)
    assert jnp.allclose(out_w, ref_w, atol=1e-5, rtol=1e-5), (out_w, ref_w)

    # 2) Unweighted case (specialized kernel, flattened lane-dense layout).
    out_u = log_cosh_loss(pred, target, None)
    jax.block_until_ready(out_u)
    ref_u = _reference(pred, target, None)
    assert jnp.allclose(out_u, ref_u, atol=1e-5, rtol=1e-5), (out_u, ref_u)

    # 3) Unweighted, multi-tile grid with 2-core split, tail mask and a
    #    phantom (clamped) tile: rows=75, tile=16 -> 5 tiles over 2 cores.
    B3, N3 = 100, 96
    pred3 = jax.random.normal(k4, (B3, N3), dtype=jnp.float32)
    target3 = jax.random.normal(k5, (B3, N3), dtype=jnp.float32)
    out3 = log_cosh_loss(pred3, target3, None, block_bytes=8 * 1024)
    jax.block_until_ready(out3)
    ref3 = _reference(pred3, target3, None)
    assert jnp.allclose(out3, ref3, atol=1e-5, rtol=1e-5), (out3, ref3)

    # 4) Weighted, N not reducible to a 128-multiple lane (fallback path),
    #    non-divisible rows + phantom tile.
    B4, N4 = 40, 100
    pred4 = jax.random.normal(k6, (B4, N4), dtype=jnp.float32)
    target4 = jax.random.normal(k7, (B4, N4), dtype=jnp.float32)
    weight4 = jax.random.uniform(k3, (N4,), dtype=jnp.float32)
    out4 = log_cosh_loss(pred4, target4, weight4, block_bytes=4 * 1024)
    jax.block_until_ready(out4)
    ref4 = _reference(pred4, target4, weight4)
    assert jnp.allclose(out4, ref4, atol=1e-5, rtol=1e-5), (out4, ref4)

    print("KERNEL_OK")
</pallas_src>

<mosaic_0001>
module attributes {stable_mosaic.version = 11 : i64} {
  func.func @_kernel_weighted(%arg0: i32, %arg1: i32, %arg2: memref<8x256xf32, #tpu.memory_space<vmem>>, %arg3: memref<8x256xf32, #tpu.memory_space<vmem>>, %arg4: memref<1x256xf32, #tpu.memory_space<vmem>>, %arg5: memref<1x128xf32, #tpu.memory_space<vmem>>, %arg6: memref<8x256xf32, #tpu.memory_space<vmem>>) attributes {dimension_semantics = [#tpu.dimension_semantics<parallel>, #tpu.dimension_semantics<arbitrary>], iteration_bounds = array<i64: 1, 1>, scalar_prefetch = 0 : i64, scratch_operands = 1 : i64, tpu.core_type = #tpu.core_type<tc>, window_params = [{transform_indices = @transform_0, window_bounds = array<i64: 8, 256>}, {transform_indices = @transform_1, window_bounds = array<i64: 8, 256>}, {pipeline_mode = #tpu.pipeline_mode<synchronous>, transform_indices = @transform_2, window_bounds = array<i64: 1, 256>}, {transform_indices = @transform_3, window_bounds = array<i64: 1, 128>}]} {
    %c0_i32 = arith.constant 0 : i32
    %0 = arith.cmpi eq, %arg1, %c0_i32 : i32
    %1 = arith.extui %0 : i1 to i32
    %c0_i32_0 = arith.constant 0 : i32
    %2 = arith.cmpi ne, %1, %c0_i32_0 : i32
    scf.if %2 {
      %cst_15 = arith.constant 0.000000e+00 : f32
      %27 = vector.broadcast %cst_15 : f32 to vector<8x256xf32>
      %c0_16 = arith.constant 0 : index
      %c0_17 = arith.constant 0 : index
      %28 = vector.load %arg6[%c0_16, %c0_17] : memref<8x256xf32, #tpu.memory_space<vmem>>, vector<8x256xf32>
      tpu.vector_store %arg6[%c0_16, %c0_17], %27 {strides = array<i32>} : memref<8x256xf32, #tpu.memory_space<vmem>>, vector<8x256xf32>,
    } else {
    }
    %c0 = arith.constant 0 : index
    %c0_1 = arith.constant 0 : index
    %3 = vector.load %arg2[%c0, %c0_1] : memref<8x256xf32, #tpu.memory_space<vmem>>, vector<8x256xf32>
    %c0_2 = arith.constant 0 : index
    %c0_3 = arith.constant 0 : index
    %4 = vector.load %arg3[%c0_2, %c0_3] : memref<8x256xf32, #tpu.memory_space<vmem>>, vector<8x256xf32>
    %5 = arith.subf %3, %4 : vector<8x256xf32>
    %cst = arith.constant 9.99999996E-13 : f32
    %6 = vector.broadcast %cst : f32 to vector<8x256xf32>
    %7 = arith.addf %5, %6 : vector<8x256xf32>
    %8 = math.absf %7 : vector<8x256xf32>
    %cst_4 = arith.constant -2.000000e+00 : f32
    %9 = vector.broadcast %cst_4 : f32 to vector<8x256xf32>
    %10 = arith.mulf %9, %8 : vector<8x256xf32>
    %11 = math.exp %10 : vector<8x256xf32>
    %12 = math.log1p %11 : vector<8x256xf32>
    %13 = arith.addf %8, %12 : vector<8x256xf32>
    %cst_5 = arith.constant 0.693147182 : f32
    %14 = vector.broadcast %cst_5 : f32 to vector<8x256xf32>
    %15 = arith.subf %13, %14 : vector<8x256xf32>
    %c0_6 = arith.constant 0 : index
    %c0_7 = arith.constant 0 : index
    %16 = vector.load %arg4[%c0_6, %c0_7] : memref<1x256xf32, #tpu.memory_space<vmem>>, vector<1x256xf32>
    %17 = vector.broadcast %16 : vector<1x256xf32> to vector<8x256xf32>
    %18 = arith.mulf %15, %17 : vector<8x256xf32>
    %c0_8 = arith.constant 0 : index
    %c0_9 = arith.constant 0 : index
    %19 = vector.load %arg6[%c0_8, %c0_9] : memref<8x256xf32, #tpu.memory_space<vmem>>, vector<8x256xf32>
    %20 = vector.shape_cast %18 : vector<8x256xf32> to vector<1x8x256xf32>
    %cst_10 = arith.constant dense<0.000000e+00> : vector<8x256xf32>
    %21 = vector.multi_reduction <add>, %20, %cst_10 [0] : vector<1x8x256xf32> to vector<8x256xf32>
    %22 = arith.addf %19, %21 : vector<8x256xf32>
    %c0_11 = arith.constant 0 : index
    %c0_12 = arith.constant 0 : index
    %23 = vector.load %arg6[%c0_11, %c0_12] : memref<8x256xf32, #tpu.memory_space<vmem>>, vector<8x256xf32>
    tpu.vector_store %arg6[%c0_11, %c0_12], %22 {strides = array<i32>} : memref<8x256xf32, #tpu.memory_space<vmem>>, vector<8x256xf32>,
    %c0_i32_13 = arith.constant 0 : i32
    %24 = arith.cmpi eq, %arg1, %c0_i32_13 : i32
    %25 = arith.extui %24 : i1 to i32
    %c0_i32_14 = arith.constant 0 : i32
    %26 = arith.cmpi ne, %25, %c0_i32_14 : i32
    scf.if %26 {
      %c0_15 = arith.constant 0 : index
      %c0_16 = arith.constant 0 : index
      %27 = vector.load %arg6[%c0_15, %c0_16] : memref<8x256xf32, #tpu.memory_space<vmem>>, vector<8x256xf32>
      %28 = vector.shape_cast %27 : vector<8x256xf32> to vector<1x8x256xf32>
      %cst_17 = arith.constant dense<0.000000e+00> : vector<1xf32>
      %29 = vector.multi_reduction <add>, %28, %cst_17 [1, 2] : vector<1x8x256xf32> to vector<1xf32>
      %30 = vector.shape_cast %29 : vector<1xf32> to vector<1x1x1xf32>
      %31 = vector.extract %30[0, 0, 0] : f32 from vector<1x1x1xf32>
      %cst_18 = arith.constant 4.8828125E-4 : f32
      %32 = arith.mulf %31, %cst_18 : f32
      %33 = tpu.iota {dimensions = array<i32: 1>} : vector<1x128xi32>
      %c0_i32_19 = arith.constant 0 : i32
      %34 = vector.broadcast %c0_i32_19 : i32 to vector<1x128xi32>
      %35 = arith.cmpi eq, %33, %34 : vector<1x128xi32>
      %cst_20 = arith.constant 0.000000e+00 : f32
      %36 = vector.broadcast %32 : f32 to vector<1x128xf32>
      %37 = vector.broadcast %cst_20 : f32 to vector<1x128xf32>
      %38 = arith.select %35, %36, %37 : vector<1x128xi1>, vector<1x128xf32>
      %c0_21 = arith.constant 0 : index
      %c0_22 = arith.constant 0 : index
      %39 = vector.load %arg5[%c0_21, %c0_22] : memref<1x128xf32, #tpu.memory_space<vmem>>, vector<1x128xf32>
      tpu.vector_store %arg5[%c0_21, %c0_22], %38 {strides = array<i32>} : memref<1x128xf32, #tpu.memory_space<vmem>>, vector<1x128xf32>,
    } else {
    }
    return
  }
  func.func @transform_0(%arg0: i32, %arg1: i32) -> (i32, i32) {
    %c1_i32 = arith.constant 1 : i32
    %0 = arith.muli %arg0, %c1_i32 : i32
    %1 = arith.addi %0, %arg1 : i32
    %c0_i32 = arith.constant 0 : i32
    %c0_i32_0 = arith.constant 0 : i32
    return %1, %c0_i32 : i32, i32
  }
  func.func @transform_1(%arg0: i32, %arg1: i32) -> (i32, i32) {
    %c1_i32 = arith.constant 1 : i32
    %0 = arith.muli %arg0, %c1_i32 : i32
    %1 = arith.addi %0, %arg1 : i32
    %c0_i32 = arith.constant 0 : i32
    %c0_i32_0 = arith.constant 0 : i32
    return %1, %c0_i32 : i32, i32
  }
  func.func @transform_2(%arg0: i32, %arg1: i32) -> (i32, i32) {
    %c0_i32 = arith.constant 0 : i32
    %c0_i32_0 = arith.constant 0 : i32
    %c0_i32_1 = arith.constant 0 : i32
    return %c0_i32, %c0_i32_0 : i32, i32
  }
  func.func @transform_3(%arg0: i32, %arg1: i32) -> (i32, i32) {
    %c0_i32 = arith.constant 0 : i32
    %c0_i32_0 = arith.constant 0 : i32
    return %c0_i32, %arg0 : i32, i32
  }
}

</mosaic_0001>

<bundles_post_ra>
// kernel: tpu_custom_call.1
= control target key start
LH: loop header
LB: loop body
LE: loop exit
PB: predicated region body
PF: predicated region fallthrough
CT: control target
= control target key end

     0   :  { %8 = vsyncpa [#allocation4], 0  ;;  %s302_s0 = inlined_call_operand.hbm [shape: f32[8,256], index: 0, kind: input, shape index: {}]   ;;  %s303_s1 = inlined_call_operand.hbm [shape: f32[8,256], index: 1, kind: input, shape index: {}]   ;;  %s304_s2 = inlined_call_operand.vmem [shape: f32[1,256], index: 2, kind: input, shape index: {}]   ;;  %s305_s3 = inlined_call_operand.hbm [shape: f32[1,128], index: 3, kind: output, shape index: {}]  }
   0x1   :  { %9 = vsyncpa [#allocation7], 0 }
   0x2   :  { %10 = vsyncpa [#allocation5], 0  ;;  %s240_s12 = smov [#allocation3]   ;;  %s241_s14 = smov [#allocation6]  }
   0x3   :  { %s21_s13 = sshll.u32 %s240_s12, 4  ;;  %s35_s15 = sshll.u32 %s241_s14, 4  ;;  %s22_s13 = int_to_ptr.vmem [resolvable:$true] %s21_s13  ;;  %s36_s15 = int_to_ptr.vmem [resolvable:$true] %s35_s15 }
   0x4   :  { %s168_s18 = scalar_lea.hbm %s302_s0, 256 }
   0x5   :  { %p169_p0 = scmp.ne.s32.totalorder %s302_s0, %s168_s18  ;;  %p172_p1 = scmp.lt.u32.totalorder %s168_s18, %s302_s0 }
   0x7   :  { %p174_p2 = pnand %p172_p1, %p169_p0 }
   0x9   :  { %177 = shalt.err (!%p174_p2)
}
   0xa   :  { %s178_s23 = scalar_lea.vmem %s22_s13, 256  ;;  %p183_p4 = scmp.lt.s32.totalorder %s22_s13, %s22_s13 }
   0xb   :  { %p179_p3 = scmp.ne.s32.totalorder %s22_s13, %s178_s23  ;;  %p184_p5 = scmp.lt.s32.totalorder %s178_s23, %s178_s23 }
   0xd   :  { %p185_p6 = por %p184_p5, %p183_p4 }
   0xf   :  { %p186_p7 = pnand %p185_p6, %p179_p3 }
  0x11   :  { %189 = shalt.err (!%p186_p7)
}
  0x12   :  { %24 = dma.hbm_to_vmem [thread:$0]  %s302_s0, 256, %s22_s13, [#allocation4]  }
  0x13   :  { %s190_s28 = scalar_lea.hbm %s303_s1, 256 }
  0x14   :  { %p191_p8 = scmp.ne.s32.totalorder %s303_s1, %s190_s28  ;;  %p194_p9 = scmp.lt.u32.totalorder %s190_s28, %s303_s1 }
  0x16   :  { %p196_p10 = pnand %p194_p9, %p191_p8 }
  0x18   :  { %199 = shalt.err (!%p196_p10)
}
  0x19   :  { %s200_s6 = scalar_lea.vmem %s36_s15, 256  ;;  %p205_p12 = scmp.lt.s32.totalorder %s36_s15, %s36_s15 }
  0x1a   :  { %p201_p11 = scmp.ne.s32.totalorder %s36_s15, %s200_s6  ;;  %p206_p13 = scmp.lt.s32.totalorder %s200_s6, %s200_s6 }
  0x1c   :  { %p207_p0 = por %p206_p13, %p205_p12 }
  0x1e   :  { %p208_p1 = pnand %p207_p0, %p201_p11 }
  0x20   :  { %211 = shalt.err (!%p208_p1)
}
  0x21   :  { %38 = dma.hbm_to_vmem [thread:$0]  %s303_s1, 256, %s36_s15, [#allocation7]  }
  0x22   :  { %234 = dma.done.wait [#allocation4], 256  }
  0x23   :  { %235 = vsyncadd [#allocation4], 4294967040 }
  0x24   :  { %236 = dma.done.wait [#allocation7], 256  }
  0x25   :  { %237 = vsyncadd [#allocation7], 4294967040  ;;  %v55_v0 = vld [vmem:[#allocation3] sm:$0xff]  ;;  %v56_v1 = vld [vmem:[#allocation3 + $0x8] sm:$0xff]  ;;  %v95_v20 = vlaneseq  ;;  %s242_s9 = smov [#allocation8]  }
  0x26   :  { %v57_v2 = vld [vmem:[#allocation6] sm:$0xff]  ;;  %v58_v3 = vld [vmem:[#allocation6 + $0x8] sm:$0xff]  ;;  %v93_v33 = vld [vmem:[%s304_s2] sm:$0x3]  ;;  %s143_s10 = sshll.u32 %s242_s9, 4  ;;  %s144_s10 = int_to_ptr.vmem [resolvable:$true] %s143_s10 }
  0x27   :  { %v59_v4 = vsub.f32 %v55_v0, %v57_v2  ;;  %v60_v5 = vsub.f32 %v56_v1, %v58_v3  ;;  %v96_v24 = vshrl.u32 %v95_v20, 7  ;;  %v132_v53 = vand.u32 127, %v95_v20  ;;  %s212_s12 = scalar_lea.vmem %s144_s10, 16  ;;  %s216_s13 = scalar_lea.vmem %s144_s10, 32 }
  0x28   :  { %p213_p2 = scmp.ne.s32.totalorder %s144_s10, %s212_s12  ;;  %p217_p3 = scmp.lt.s32.totalorder %s144_s10, %s144_s10 }
  0x29   :  { %v61_v6 = vadd.f32 1e-12, %v59_v4  ;;  %v62_v7 = vadd.f32 1e-12, %v60_v5  ;;  %v97_v29 = vsub.s32 0, %v96_v24  ;;  %v101_v30 = vsub.s32 1, %v96_v24  ;;  %p218_p4 = scmp.lt.s32.totalorder %s216_s13, %s212_s12 }
  0x2a   :  { %vm133_vm2 = vcmp.eq.s32.totalorder %v132_v53, 0 }
  0x2b   :  { %v63_v8 = vand.u32 2147483647, %v61_v6  ;;  %v64_v9 = vand.u32 2147483647, %v62_v7  ;;  %v98_v38 = vrot.slane %v93_v33, %v97_v29  ;;  %v102_v40 = vrot.slane %v93_v33, %v101_v30  ;;  %p219_p5 = por %p218_p4, %p217_p3 }
  0x2d   :  { %v65_v10 = vmul.f32 -2.0, %v63_v8  ;;  %v66_v11 = vmul.f32 -2.0, %v64_v9  ;;  %p220_p6 = pnand %p219_p5, %p213_p2 }
  0x2f   :  { %v67_v12 = vmul.f32 1.442695, %v65_v10  ;;  %v69_v13 = vmul.f32 1.442695, %v66_v11 }
  0x31   :  { %160 = vpow2.f32 %v67_v12 }
  0x32   :  { %162 = vpow2.f32 %v69_v13 }
  0x3b   :  { %v161_v14 = vpop.eup %160 }
  0x3c   :  { %v163_v15 = vpop.eup %162  ;;  %v71_v16 = vadd.f32 1.0, %v161_v14  ;;  %v74_v18 = vmul.f32 -0.5, %v161_v14  ;;  %v77_v22 = vand.u32 2147483647, %v161_v14 }
  0x3d   :  { %v80_v17 = vadd.f32 1.0, %v163_v15  ;;  %v83_v19 = vmul.f32 -0.5, %v163_v15  ;;  %v86_v25 = vand.u32 2147483647, %v163_v15 }
  0x3e   :  { %164 = vlog2.f32 %v71_v16  ;;  %v75_v21 = vadd.f32 1.0, %v74_v18  ;;  %vm78_vm0 = vcmp.lt.f32.partialorder %v77_v22, 0.0004427343 }
  0x3f   :  { %166 = vlog2.f32 %v80_v17  ;;  %v84_v23 = vadd.f32 1.0, %v83_v19  ;;  %vm87_vm1 = vcmp.lt.f32.partialorder %v86_v25, 0.0004427343 }
  0x40   :  { %v76_v26 = vmul.f32 %v161_v14, %v75_v21 }
  0x41   :  { %v85_v28 = vmul.f32 %v163_v15, %v84_v23 }
  0x48   :  { %v165_v27 = vpop.eup %164 }
  0x49   :  { %v167_v31 = vpop.eup %166  ;;  %v73_v32 = vmul.f32 0.6931472, %v165_v27 }
  0x4a   :  { %v82_v34 = vmul.f32 0.6931472, %v167_v31 }
  0x4b   :  { %v79_v35 = vsel %vm78_vm0, %v76_v26, %v73_v32 }
  0x4c   :  { %v88_v36 = vsel %vm87_vm1, %v85_v28, %v82_v34  ;;  %v89_v37 = vadd.f32 %v79_v35, %v63_v8 }
  0x4d   :  { %v90_v39 = vadd.f32 %v88_v36, %v64_v9 }
  0x4e   :  { %v153_v41 = vadd.f32 -0.6931472, %v89_v37 }
  0x4f   :  { %v154_v42 = vadd.f32 -0.6931472, %v90_v39 }
  0x50   :  { %v105_v43 = vmul.f32 %v153_v41, %v98_v38 }
  0x51   :  { %v106_v44 = vmul.f32 %v154_v42, %v102_v40 }
  0x53   :  { %v120_v45 = vadd.f32 %v106_v44, %v105_v43 }
  0x55   :  { %121 = vadd.xlane.f32.xlu0 %v120_v45 }
  0xe2   :  { %v122_v46 = vpop.xlane.xlu0 %121 }
  0xe3   :  { %v123_v47 = vrot.slane %v122_v46, 4 }
  0xe5   :  { %v124_v48 = vadd.f32 %v123_v47, %v122_v46 }
  0xe7   :  { %v125_v49 = vrot.slane %v124_v48, 2 }
  0xe9   :  { %v126_v50 = vadd.f32 %v125_v49, %v124_v48 }
  0xeb   :  { %v127_v51 = vrot.slane %v126_v50, 1 }
  0xed   :  { %v128_v52 = vadd.f32 %v127_v51, %v126_v50 }
  0xef   :  { %155 = vpush %v128_v52 }
 0x120   :  { %s156_s2 = spop %155 }
 0x121   :  { %s130_s11 = smul.f32 0.00048828125, %s156_s2 }
 0x123   :  { %v134_v54 = vstv %s130_s11 }
 0x124   :  { %v135_v55 = vsel %vm133_vm2, %v134_v54, 0.0 }
 0x125   :  { %136 = vst [vmem:[#allocation8] sm:$0x1] %v135_v55 }
 0x126   :  { %223 = shalt.err (!%p220_p6)
}
 0x127   :  { %s224_s16 = scalar_lea.hbm %s305_s3, 16 }
 0x128   :  { %p225_p7 = scmp.ne.s32.totalorder %s305_s3, %s224_s16  ;;  %p228_p8 = scmp.lt.u32.totalorder %s224_s16, %s305_s3 }
 0x12a   :  { %p230_p9 = pnand %p228_p8, %p225_p7 }
 0x12c   :  { %233 = shalt.err (!%p230_p9)
}
 0x12d   :  { %146 = dma.vmem_to_hbm [thread:$0]  %s144_s10, 16, %s305_s3, [#allocation5]  }
 0x12e   :  { %238 = dma.done.wait [#allocation5], 16  }
 0x12f   :  { %239 = vsyncadd [#allocation5], 4294967280 }
 0x130   :  { %150 = vsyncpa [#allocation4], 1 }
 0x131   :  { %151 = vsyncpa [#allocation7], 1 }
 0x132   :  { %152 = vsyncpa [#allocation5], 1 }

</bundles_post_ra>
